<compile_context>
chip_gen: v7x
topology: tpu7x:2x2x1
jax: 0.10.0
libtpu: 0.0.40
codegen_flags: <defaults>
</compile_context>

<pallas_src>
import functools

import jax
import jax.numpy as jnp
from jax.experimental import pallas as pl
from jax.experimental.pallas import tpu as pltpu


def _round_up(a: int, b: int) -> int:
    return (a + b - 1) // b * b


def _cdiv(a: int, b: int) -> int:
    return (a + b - 1) // b


def ffn_kernel(x_ref, w1_ref, w3_ref, w2_ref, g_ref, o_ref, acc_ref, *, eps):
    """Grid = (M tiles, hidden tiles). Hidden axis is a reduction for w2."""
    j = pl.program_id(1)

    @pl.when(j == 0)
    def _init():
        acc_ref[...] = jnp.zeros_like(acc_ref)

    x = x_ref[...].astype(jnp.bfloat16)  # cast on VPU; x stays native in HBM
    # w1(x), w3(x) column tiles on the MXU, f32 accumulation.
    h1 = jnp.dot(x, w1_ref[...], preferred_element_type=jnp.float32)  # [tm, tn]
    h3 = jnp.dot(x, w3_ref[...], preferred_element_type=jnp.float32)  # [tm, tn]

    # silu(w1(x) * w3(x))  -- silu of the product, as in the PyTorch forward.
    p = h1 * h3
    gated = p * jax.nn.sigmoid(p)  # sigmoid lowers to EUP; mult on VPU

    # Partial w2 contribution for this hidden tile; accumulate in f32 scratch.
    acc_ref[...] += jnp.dot(gated.astype(w2_ref.dtype), w2_ref[...],
                            preferred_element_type=jnp.float32)

    @pl.when(j == pl.num_programs(1) - 1)
    def _finalize():
        # RMSNorm(eps, elementwise affine) over the full D row, in f32.
        tm, D = acc_ref.shape
        chunk = min(D, 512)

        # Chunked sum-of-squares: never materializes a full (tm, D) f32 temp.
        ss = jnp.zeros((tm, 1), jnp.float32)
        for c in range(0, D, chunk):
            e = min(c + chunk, D)
            blk = acc_ref[:, c:e]
            ss = ss + jnp.sum(blk * blk, axis=-1, keepdims=True)
        inv = jax.lax.rsqrt(ss * (1.0 / D) + eps)

        # Chunked normalize + affine + store (lane-dense 128-multiple slices).
        for c in range(0, D, chunk):
            e = min(c + chunk, D)
            o_ref[:, c:e] = (acc_ref[:, c:e] * inv
                             * g_ref[:, c:e].astype(jnp.float32)).astype(o_ref.dtype)


def ffn_pallas(x, w1_t, w3_t, w2_t, gamma, *, eps=1e-5, tm=None, tn=None):
    """x: [M, D]; w*_t: [D, D] (pre-transposed [in, out], ideally already bf16);
    gamma: [D]."""
    M, D = x.shape
    out_dtype = x.dtype
    out_isz = jnp.dtype(out_dtype).itemsize
    x_isz = jnp.dtype(x.dtype).itemsize

    # Weights should be pre-cast to bf16 once at parameter init (done by the
    # caller); only cast here if that wasn't done, to stay correct.
    w1b = w1_t if w1_t.dtype == jnp.bfloat16 else w1_t.astype(jnp.bfloat16)
    w3b = w3_t if w3_t.dtype == jnp.bfloat16 else w3_t.astype(jnp.bfloat16)
    w2b = w2_t if w2_t.dtype == jnp.bfloat16 else w2_t.astype(jnp.bfloat16)
    g2d = gamma.reshape(1, D)

    # ---------------- generation-aware VMEM budget ----------------
    try:
        vmem_cap = int(pltpu.get_tpu_info().vmem_capacity_bytes)
    except Exception:
        vmem_cap = 128 << 20
    vmem_limit = max(32 << 20, int(0.8 * vmem_cap))
    big_vmem = vmem_cap >= (100 << 20)   # v5e / v6e: 128 MiB; v7x: 64 MiB / TC

    # ---------------- hidden-dim (reduction) tile ----------------
    if tn is None:
        tn_cap = 256 if big_vmem else 128
        cands = [c for c in (512, 384, 256, 128) if c <= tn_cap and D % c == 0]
        # TODO(synk): for D not a multiple of 128, pad D once at init instead of
        # falling back to a full-D weight tile.
        tn = cands[0] if cands else D

    # ---------------- row (parallel) tile ----------------
    if tm is None:
        tm = 512 if big_vmem else 256
    tm = min(int(tm), _round_up(M, 8))
    tm = max(8, _round_up(tm, 8))
    if not big_vmem and M >= 256:
        # v7x: keep >= 2 row tiles so the "parallel" axis spans both TensorCores.
        tm = min(tm, _round_up(_cdiv(M, 2), 128))

    # Shrink tiles until the pipelined working set fits the VMEM budget.
    def _footprint(tm_, tn_, wbuf):
        x_b = 2 * tm_ * D * x_isz                     # double-buffered x tile
        w_b = wbuf * (2 * D * tn_ + tn_ * D) * 2      # bf16 w1+w3 (D,tn) + w2 (tn,D)
        o_b = 2 * tm_ * D * out_isz                   # output tile
        acc = tm_ * D * 4                             # f32 accumulator scratch
        tmp = 4 * tm_ * tn_ * 4                       # h1, h3, p, gated
        return x_b + w_b + o_b + acc + tmp + (2 << 20)

    while _footprint(tm, tn, 2) > vmem_limit and tm > 128:
        tm = max(128, tm // 2)
    while (_footprint(tm, tn, 2) > vmem_limit and tn > 128
           and (tn // 2) % 128 == 0 and D % (tn // 2) == 0):
        tn //= 2

    grid = (_cdiv(M, tm), _cdiv(D, tn))

    # Triple-buffer the weight streams when the reduction axis is long enough
    # and there is VMEM headroom (v6e case); never on tight-VMEM parts.
    w_pipe = {}
    if big_vmem and grid[1] >= 3 and _footprint(tm, tn, 3) <= vmem_limit:
        w_pipe = dict(pipeline_mode=pl.Buffered(3))

    in_specs = [
        pl.BlockSpec((tm, D), lambda i, j: (i, 0)),             # x rows (native dtype)
        pl.BlockSpec((D, tn), lambda i, j: (0, j), **w_pipe),   # w1^T column tile
        pl.BlockSpec((D, tn), lambda i, j: (0, j), **w_pipe),   # w3^T column tile
        pl.BlockSpec((tn, D), lambda i, j: (j, 0), **w_pipe),   # w2^T row tile (reduction)
        pl.BlockSpec((1, D), lambda i, j: (0, 0)),              # RMSNorm gamma
    ]

    # ---------------- cost hint (weights re-streamed once per M tile) --------
    cost = pl.CostEstimate(
        flops=int(6 * M * D * D),                     # three D x D matmuls
        transcendentals=int(M * D),                   # sigmoid
        bytes_accessed=int(grid[0] * 3 * D * D * 2    # bf16 weights per M tile
                           + M * D * x_isz            # x
                           + M * D * out_isz          # output
                           + D * 4),                  # gamma
    )

    out = pl.pallas_call(
        functools.partial(ffn_kernel, eps=eps),
        out_shape=jax.ShapeDtypeStruct((M, D), out_dtype),
        grid_spec=pltpu.PrefetchScalarGridSpec(
            num_scalar_prefetch=0,
            grid=grid,
            in_specs=in_specs,
            out_specs=pl.BlockSpec((tm, D), lambda i, j: (i, 0)),
            scratch_shapes=[pltpu.VMEM((tm, D), jnp.float32)],
        ),
        compiler_params=pltpu.CompilerParams(
            dimension_semantics=("parallel", "arbitrary"),
            vmem_limit_bytes=int(vmem_limit),
        ),
        cost_estimate=cost,
    )(x, w1b, w3b, w2b, g2d)

    return out


def ffn_reference(x, w1, w3, w2, gamma, eps=1e-5):
    """Pure-JAX reference mirroring the PyTorch module (nn.Linear weights in
    [out, in] layout; bf16 MXU operands, f32 accumulation / epilogue — same
    numeric recipe as the kernel)."""
    xb = x.astype(jnp.bfloat16)
    h1 = jnp.dot(xb, w1.T.astype(jnp.bfloat16), preferred_element_type=jnp.float32)
    h3 = jnp.dot(xb, w3.T.astype(jnp.bfloat16), preferred_element_type=jnp.float32)
    p = h1 * h3
    gated = p * jax.nn.sigmoid(p)
    h2 = jnp.dot(gated.astype(jnp.bfloat16), w2.T.astype(jnp.bfloat16),
                 preferred_element_type=jnp.float32)
    ms = jnp.mean(h2 * h2, axis=-1, keepdims=True)
    normed = h2 * jax.lax.rsqrt(ms + eps)
    return (normed * gamma.astype(jnp.float32)).astype(x.dtype)


if __name__ == "__main__":
    # Small shapes consistent with the module: batch=2, seq=8, emb_dim=128.
    B, S, D = 2, 8, 128
    key = jax.random.PRNGKey(0)
    kx, k1, k2, k3 = jax.random.split(key, 4)

    x = jax.random.normal(kx, (B, S, D), dtype=jnp.float32)

    # nn.Linear(emb, emb, bias=False) weights are [out, in] (PyTorch layout).
    scale = 1.0 / (D ** 0.5)
    w1 = jax.random.uniform(k1, (D, D), jnp.float32, -scale, scale)
    w2 = jax.random.uniform(k2, (D, D), jnp.float32, -scale, scale)
    w3 = jax.random.uniform(k3, (D, D), jnp.float32, -scale, scale)
    gamma = jnp.ones((D,), dtype=jnp.float32)  # RMSNorm weight init = ones

    # One-time parameter prep: transpose to [in, out] and cast to bf16 ONCE,
    # so no per-call weight conversion pass is needed.
    w1_t = jnp.asarray(w1.T, dtype=jnp.bfloat16)
    w2_t = jnp.asarray(w2.T, dtype=jnp.bfloat16)
    w3_t = jnp.asarray(w3.T, dtype=jnp.bfloat16)
    w1_t, w2_t, w3_t = jax.block_until_ready((w1_t, w2_t, w3_t))

    x2d = x.reshape(B * S, D)
    out = ffn_pallas(x2d, w1_t, w3_t, w2_t, gamma)
    out = jax.block_until_ready(out).reshape(B, S, D)

    ref = ffn_reference(x2d, w1, w3, w2, gamma).reshape(B, S, D)
    assert jnp.allclose(out, ref, atol=1e-2, rtol=1e-2), "mismatch vs reference"

    print("KERNEL_OK")
</pallas_src>

<mosaic_0001>
module attributes {stable_mosaic.version = 11 : i64} {
  func.func @ffn_kernel(%arg0: i32, %arg1: i32, %arg2: memref<16x128xf32, #tpu.memory_space<vmem>>, %arg3: memref<128x128xbf16, #tpu.memory_space<vmem>>, %arg4: memref<128x128xbf16, #tpu.memory_space<vmem>>, %arg5: memref<128x128xbf16, #tpu.memory_space<vmem>>, %arg6: memref<1x128xf32, #tpu.memory_space<vmem>>, %arg7: memref<16x128xf32, #tpu.memory_space<vmem>>, %arg8: memref<16x128xf32, #tpu.memory_space<vmem>>) attributes {dimension_semantics = [#tpu.dimension_semantics<parallel>, #tpu.dimension_semantics<arbitrary>], iteration_bounds = array<i64: 1, 1>, scalar_prefetch = 0 : i64, scratch_operands = 1 : i64, tpu.core_type = #tpu.core_type<tc>, window_params = [{transform_indices = @transform_0, window_bounds = array<i64: 16, 128>}, {transform_indices = @transform_1, window_bounds = array<i64: 128, 128>}, {transform_indices = @transform_2, window_bounds = array<i64: 128, 128>}, {transform_indices = @transform_3, window_bounds = array<i64: 128, 128>}, {pipeline_mode = #tpu.pipeline_mode<synchronous>, transform_indices = @transform_4, window_bounds = array<i64: 1, 128>}, {transform_indices = @transform_5, window_bounds = array<i64: 16, 128>}]} {
    %c0_i32 = arith.constant 0 : i32
    %0 = arith.cmpi eq, %arg1, %c0_i32 : i32
    %1 = arith.extui %0 : i1 to i32
    %c0_i32_0 = arith.constant 0 : i32
    %2 = arith.cmpi ne, %1, %c0_i32_0 : i32
    scf.if %2 {
      %cst_17 = arith.constant 0.000000e+00 : f32
      %25 = vector.broadcast %cst_17 : f32 to vector<16x128xf32>
      %c0_18 = arith.constant 0 : index
      %c0_19 = arith.constant 0 : index
      %26 = vector.load %arg8[%c0_18, %c0_19] : memref<16x128xf32, #tpu.memory_space<vmem>>, vector<16x128xf32>
      tpu.vector_store %arg8[%c0_18, %c0_19], %25 {strides = array<i32>} : memref<16x128xf32, #tpu.memory_space<vmem>>, vector<16x128xf32>,
    } else {
    }
    %c0 = arith.constant 0 : index
    %c0_1 = arith.constant 0 : index
    %3 = vector.load %arg2[%c0, %c0_1] : memref<16x128xf32, #tpu.memory_space<vmem>>, vector<16x128xf32>
    %4 = arith.truncf %3 : vector<16x128xf32> to vector<16x128xbf16>
    %c0_2 = arith.constant 0 : index
    %c0_3 = arith.constant 0 : index
    %5 = vector.load %arg3[%c0_2, %c0_3] : memref<128x128xbf16, #tpu.memory_space<vmem>>, vector<128x128xbf16>
    %cst = arith.constant dense<0.000000e+00> : vector<16x128xf32>
    %6 = tpu.matmul %4, %5, %cst {dimension_numbers = #tpu.dot_dimension_numbers<[1], [0], [0], [1], [0, 0, 1, 1], [], []>} : vector<16x128xbf16>, vector<128x128xbf16>, vector<16x128xf32> -> vector<16x128xf32>
    %c0_4 = arith.constant 0 : index
    %c0_5 = arith.constant 0 : index
    %7 = vector.load %arg4[%c0_4, %c0_5] : memref<128x128xbf16, #tpu.memory_space<vmem>>, vector<128x128xbf16>
    %cst_6 = arith.constant dense<0.000000e+00> : vector<16x128xf32>
    %8 = tpu.matmul %4, %7, %cst_6 {dimension_numbers = #tpu.dot_dimension_numbers<[1], [0], [0], [1], [0, 0, 1, 1], [], []>} : vector<16x128xbf16>, vector<128x128xbf16>, vector<16x128xf32> -> vector<16x128xf32>
    %9 = arith.mulf %6, %8 : vector<16x128xf32>
    %10 = arith.negf %9 : vector<16x128xf32>
    %11 = math.exp %10 : vector<16x128xf32>
    %cst_7 = arith.constant 1.000000e+00 : f32
    %12 = vector.broadcast %cst_7 : f32 to vector<16x128xf32>
    %13 = arith.addf %12, %11 : vector<16x128xf32>
    %14 = arith.divf %12, %13 : vector<16x128xf32>
    %15 = arith.mulf %9, %14 : vector<16x128xf32>
    %c0_8 = arith.constant 0 : index
    %c0_9 = arith.constant 0 : index
    %16 = vector.load %arg8[%c0_8, %c0_9] : memref<16x128xf32, #tpu.memory_space<vmem>>, vector<16x128xf32>
    %17 = arith.truncf %15 : vector<16x128xf32> to vector<16x128xbf16>
    %c0_10 = arith.constant 0 : index
    %c0_11 = arith.constant 0 : index
    %18 = vector.load %arg5[%c0_10, %c0_11] : memref<128x128xbf16, #tpu.memory_space<vmem>>, vector<128x128xbf16>
    %cst_12 = arith.constant dense<0.000000e+00> : vector<16x128xf32>
    %19 = tpu.matmul %17, %18, %cst_12 {dimension_numbers = #tpu.dot_dimension_numbers<[1], [0], [0], [1], [0, 0, 1, 1], [], []>} : vector<16x128xbf16>, vector<128x128xbf16>, vector<16x128xf32> -> vector<16x128xf32>
    %20 = arith.addf %16, %19 : vector<16x128xf32>
    %c0_13 = arith.constant 0 : index
    %c0_14 = arith.constant 0 : index
    %21 = vector.load %arg8[%c0_13, %c0_14] : memref<16x128xf32, #tpu.memory_space<vmem>>, vector<16x128xf32>
    tpu.vector_store %arg8[%c0_13, %c0_14], %20 {strides = array<i32>} : memref<16x128xf32, #tpu.memory_space<vmem>>, vector<16x128xf32>,
    %c0_i32_15 = arith.constant 0 : i32
    %22 = arith.cmpi eq, %arg1, %c0_i32_15 : i32
    %23 = arith.extui %22 : i1 to i32
    %c0_i32_16 = arith.constant 0 : i32
    %24 = arith.cmpi ne, %23, %c0_i32_16 : i32
    scf.if %24 {
      %cst_17 = arith.constant 0.000000e+00 : f32
      %25 = vector.broadcast %cst_17 : f32 to vector<16x1xf32>
      %c0_18 = arith.constant 0 : index
      %c0_19 = arith.constant 0 : index
      %26 = vector.load %arg8[%c0_18, %c0_19] : memref<16x128xf32, #tpu.memory_space<vmem>>, vector<16x128xf32>
      %27 = arith.mulf %26, %26 : vector<16x128xf32>
      %cst_20 = arith.constant dense<0.000000e+00> : vector<16xf32>
      %28 = vector.multi_reduction <add>, %27, %cst_20 [1] : vector<16x128xf32> to vector<16xf32>
      %29 = vector.shape_cast %28 : vector<16xf32> to vector<16x1xf32>
      %30 = arith.addf %25, %29 : vector<16x1xf32>
      %cst_21 = arith.constant 7.812500e-03 : f32
      %31 = vector.broadcast %cst_21 : f32 to vector<16x1xf32>
      %32 = arith.mulf %30, %31 : vector<16x1xf32>
      %cst_22 = arith.constant 9.99999974E-6 : f32
      %33 = vector.broadcast %cst_22 : f32 to vector<16x1xf32>
      %34 = arith.addf %32, %33 : vector<16x1xf32>
      %35 = math.rsqrt %34 : vector<16x1xf32>
      %c0_23 = arith.constant 0 : index
      %c0_24 = arith.constant 0 : index
      %36 = vector.load %arg8[%c0_23, %c0_24] : memref<16x128xf32, #tpu.memory_space<vmem>>, vector<16x128xf32>
      %37 = vector.broadcast %35 : vector<16x1xf32> to vector<16x128xf32>
      %38 = arith.mulf %36, %37 : vector<16x128xf32>
      %c0_25 = arith.constant 0 : index
      %c0_26 = arith.constant 0 : index
      %39 = vector.load %arg6[%c0_25, %c0_26] : memref<1x128xf32, #tpu.memory_space<vmem>>, vector<1x128xf32>
      %40 = vector.broadcast %39 : vector<1x128xf32> to vector<16x128xf32>
      %41 = arith.mulf %38, %40 : vector<16x128xf32>
      %c0_27 = arith.constant 0 : index
      %c0_28 = arith.constant 0 : index
      %42 = vector.load %arg7[%c0_27, %c0_28] : memref<16x128xf32, #tpu.memory_space<vmem>>, vector<16x128xf32>
      tpu.vector_store %arg7[%c0_27, %c0_28], %41 {strides = array<i32>} : memref<16x128xf32, #tpu.memory_space<vmem>>, vector<16x128xf32>,
    } else {
    }
    return
  }
  func.func @transform_0(%arg0: i32, %arg1: i32) -> (i32, i32) {
    %c0_i32 = arith.constant 0 : i32
    %c0_i32_0 = arith.constant 0 : i32
    return %arg0, %c0_i32 : i32, i32
  }
  func.func @transform_1(%arg0: i32, %arg1: i32) -> (i32, i32) {
    %c0_i32 = arith.constant 0 : i32
    %c0_i32_0 = arith.constant 0 : i32
    return %c0_i32, %arg1 : i32, i32
  }
  func.func @transform_2(%arg0: i32, %arg1: i32) -> (i32, i32) {
    %c0_i32 = arith.constant 0 : i32
    %c0_i32_0 = arith.constant 0 : i32
    return %c0_i32, %arg1 : i32, i32
  }
  func.func @transform_3(%arg0: i32, %arg1: i32) -> (i32, i32) {
    %c0_i32 = arith.constant 0 : i32
    %c0_i32_0 = arith.constant 0 : i32
    return %arg1, %c0_i32 : i32, i32
  }
  func.func @transform_4(%arg0: i32, %arg1: i32) -> (i32, i32) {
    %c0_i32 = arith.constant 0 : i32
    %c0_i32_0 = arith.constant 0 : i32
    %c0_i32_1 = arith.constant 0 : i32
    return %c0_i32, %c0_i32_0 : i32, i32
  }
  func.func @transform_5(%arg0: i32, %arg1: i32) -> (i32, i32) {
    %c0_i32 = arith.constant 0 : i32
    %c0_i32_0 = arith.constant 0 : i32
    return %arg0, %c0_i32 : i32, i32
  }
}

</mosaic_0001>

<bundles_post_ra>
// kernel: tpu_custom_call.1
= control target key start
LH: loop header
LB: loop body
LE: loop exit
PB: predicated region body
PF: predicated region fallthrough
CT: control target
= control target key end

     0   :  { %10 = vsyncpa [#allocation4], 0  ;;  %s947_s0 = inlined_call_operand.hbm [shape: f32[16,128], index: 0, kind: input, shape index: {}]   ;;  %s948_s1 = inlined_call_operand.hbm [shape: bf16[128,128], index: 1, kind: input, shape index: {}]   ;;  %s949_s2 = inlined_call_operand.hbm [shape: bf16[128,128], index: 2, kind: input, shape index: {}]   ;;  %s950_s3 = inlined_call_operand.hbm [shape: bf16[128,128], index: 3, kind: input, shape index: {}]   ;;  %s951_s4 = inlined_call_operand.hbm [shape: f32[1,128], index: 4, kind: input, shape index: {}]   ;;  %s952_s5 = inlined_call_operand.hbm [shape: f32[16,128], index: 5, kind: output, shape index: {}]  }
   0x1   :  { %11 = vsyncpa [#allocation7], 0 }
   0x2   :  { %12 = vsyncpa [#allocation10], 0 }
   0x3   :  { %13 = vsyncpa [#allocation5], 0  ;;  %s788_s18 = smov [#allocation6]   ;;  %s648_s22 = scalar_lea.hbm %s948_s1, 1024 }
   0x4   :  { %s31_s19 = sshll.u32 %s788_s18, 4  ;;  %p649_p0 = scmp.ne.s32.totalorder %s948_s1, %s648_s22  ;;  %s32_s19 = int_to_ptr.vmem [resolvable:$true] %s31_s19 }
   0x5   :  { %p652_p1 = scmp.lt.u32.totalorder %s648_s22, %s948_s1 }
   0x7   :  { %p654_p2 = pnand %p652_p1, %p649_p0 }
   0x9   :  { %657 = shalt.err (!%p654_p2)
}
   0xa   :  { %s658_s27 = scalar_lea.vmem %s32_s19, 1024  ;;  %p663_p4 = scmp.lt.s32.totalorder %s32_s19, %s32_s19 }
   0xb   :  { %p659_p3 = scmp.ne.s32.totalorder %s32_s19, %s658_s27  ;;  %p664_p5 = scmp.lt.s32.totalorder %s658_s27, %s658_s27 }
   0xd   :  { %p665_p6 = por %p664_p5, %p663_p4 }
   0xf   :  { %p666_p7 = pnand %p665_p6, %p659_p3 }
  0x11   :  { %669 = shalt.err (!%p666_p7)
}
  0x12   :  { %s789_s28 = smov 64   ;;  %s790_s29 = smov 4  }
  0x13   :  { %37 = dma.hbm_to_vmem [thread:$0]  %s948_s1, 1024, %s32_s19, [#allocation7], %s789_s28, %s789_s28, %s790_s29  }
  0x14   :  { %s791_s7 = smov [#allocation9]   ;;  %s792_s9 = smov [#allocation3]  }
  0x15   :  { %s55_s8 = sshll.u32 %s791_s7, 4  ;;  %s19_s10 = sshll.u32 %s792_s9, 4  ;;  %s56_s8 = int_to_ptr.vmem [resolvable:$true] %s55_s8  ;;  %s20_s10 = int_to_ptr.vmem [resolvable:$true] %s19_s10 }
  0x16   :  { %s670_s13 = scalar_lea.hbm %s950_s3, 1024 }
  0x17   :  { %p671_p8 = scmp.ne.s32.totalorder %s950_s3, %s670_s13  ;;  %p674_p9 = scmp.lt.u32.totalorder %s670_s13, %s950_s3 }
  0x19   :  { %p676_p10 = pnand %p674_p9, %p671_p8 }
  0x1b   :  { %679 = shalt.err (!%p676_p10)
}
  0x1c   :  { %s680_s1 = scalar_lea.vmem %s56_s8, 1024  ;;  %p685_p12 = scmp.lt.s32.totalorder %s56_s8, %s56_s8 }
  0x1d   :  { %p681_p11 = scmp.ne.s32.totalorder %s56_s8, %s680_s1  ;;  %p686_p13 = scmp.lt.s32.totalorder %s680_s1, %s680_s1 }
  0x1f   :  { %p687_p0 = por %p686_p13, %p685_p12 }
  0x21   :  { %p688_p1 = pnand %p687_p0, %p681_p11 }
  0x23   :  { %691 = shalt.err (!%p688_p1)
}
  0x24   :  { %61 = dma.hbm_to_vmem [thread:$0]  %s950_s3, 1024, %s56_s8, [#allocation10], %s789_s28, %s789_s28, %s790_s29  }
  0x25   :  { %s692_s22 = scalar_lea.hbm %s947_s0, 256 }
  0x26   :  { %p693_p2 = scmp.ne.s32.totalorder %s947_s0, %s692_s22  ;;  %p696_p3 = scmp.lt.u32.totalorder %s692_s22, %s947_s0 }
  0x28   :  { %p698_p4 = pnand %p696_p3, %p693_p2 }
  0x2a   :  { %701 = shalt.err (!%p698_p4)
}
  0x2b   :  { %s702_s27 = scalar_lea.vmem %s20_s10, 256  ;;  %p707_p6 = scmp.lt.s32.totalorder %s20_s10, %s20_s10 }
  0x2c   :  { %p703_p5 = scmp.ne.s32.totalorder %s20_s10, %s702_s27  ;;  %p708_p7 = scmp.lt.s32.totalorder %s702_s27, %s702_s27 }
  0x2e   :  { %p709_p8 = por %p708_p7, %p707_p6 }
  0x30   :  { %p710_p9 = pnand %p709_p8, %p703_p5 }
  0x32   :  { %713 = shalt.err (!%p710_p9)
}
  0x33   :  { %s793_s3 = smov 128   ;;  %s794_s30 = smov 8  }
  0x34   :  { %25 = dma.hbm_to_vmem [thread:$0]  %s947_s0, 256, %s20_s10, [#allocation4], %s793_s3, %s793_s3, %s794_s30  }
  0x35   :  { %s795_s8 = smov [#allocation8]   ;;  %s796_s11 = smov [#allocation11]  }
  0x36   :  { %s43_s9 = sshll.u32 %s795_s8, 4  ;;  %s68_s12 = sshll.u32 %s796_s11, 4  ;;  %s44_s9 = int_to_ptr.vmem [resolvable:$true] %s43_s9  ;;  %s69_s12 = int_to_ptr.vmem [resolvable:$true] %s68_s12 }
  0x37   :  { %s714_s15 = scalar_lea.hbm %s949_s2, 1024 }
  0x38   :  { %p715_p10 = scmp.ne.s32.totalorder %s949_s2, %s714_s15  ;;  %p718_p11 = scmp.lt.u32.totalorder %s714_s15, %s949_s2 }
  0x3a   :  { %p720_p12 = pnand %p718_p11, %p715_p10 }
  0x3c   :  { %723 = shalt.err (!%p720_p12)
}
  0x3d   :  { %s724_s0 = scalar_lea.vmem %s44_s9, 1024  ;;  %p729_p0 = scmp.lt.s32.totalorder %s44_s9, %s44_s9 }
  0x3e   :  { %p725_p13 = scmp.ne.s32.totalorder %s44_s9, %s724_s0  ;;  %p730_p1 = scmp.lt.s32.totalorder %s724_s0, %s724_s0 }
  0x40   :  { %p731_p2 = por %p730_p1, %p729_p0 }
  0x42   :  { %p732_p3 = pnand %p731_p2, %p725_p13 }
  0x44   :  { %735 = shalt.err (!%p732_p3)
}
  0x45   :  { %49 = dma.hbm_to_vmem [thread:$0]  %s949_s2, 1024, %s44_s9, [#allocation7], %s789_s28, %s789_s28, %s790_s29  }
  0x46   :  { %s736_s22 = scalar_lea.hbm %s951_s4, 16 }
  0x47   :  { %p737_p4 = scmp.ne.s32.totalorder %s951_s4, %s736_s22  ;;  %p740_p5 = scmp.lt.u32.totalorder %s736_s22, %s951_s4 }
  0x49   :  { %p742_p6 = pnand %p740_p5, %p737_p4 }
  0x4b   :  { %745 = shalt.err (!%p742_p6)
}
  0x4c   :  { %s746_s27 = scalar_lea.vmem %s69_s12, 16  ;;  %s750_s6 = scalar_lea.vmem %s69_s12, 32 }
  0x4d   :  { %p747_p7 = scmp.ne.s32.totalorder %s69_s12, %s746_s27  ;;  %p751_p8 = scmp.lt.s32.totalorder %s69_s12, %s69_s12 }
  0x4e   :  { %p752_p9 = scmp.lt.s32.totalorder %s750_s6, %s746_s27 }
  0x50   :  { %p753_p10 = por %p752_p9, %p751_p8 }
  0x52   :  { %p754_p11 = pnand %p753_p10, %p747_p7 }
  0x54   :  { %757 = shalt.err (!%p754_p11)
}
  0x55   :  { %71 = dma.hbm_to_vmem [thread:$0]  %s951_s4, 16, %s69_s12, [#allocation10]  }
  0x56   :  { %780 = dma.done.wait [#allocation4], 256  }
  0x57   :  { %781 = vsyncadd [#allocation4], 4294967040 }
  0x58   :  { %782 = dma.done.wait [#allocation7], 2048  }
  0x59   :  { %783 = vsyncadd [#allocation7], 4294965248 }
  0x5a   :  { %784 = dma.done.wait [#allocation10], 1040  }
  0x5b   :  { %785 = vsyncadd [#allocation10], 4294966256  ;;  %v797_v0 = vmov 0.0   ;;  %vm798_vm0 = vmmov 0   ;;  %v612_v1 = vld [vmem:[#allocation6] sm:$0xff]   ;;  %v614_v3 = vld [vmem:[#allocation6 + $0x8] sm:$0xff]  }
  0x5c   :  { %540 = vmatprep.subr.bf16.mxu0 %v797_v0  ;;  %560 = vmatprep.subr.bf16.mxu1 %v797_v0  ;;  %v613_v2 = vld [vmem:[#allocation8] sm:$0xff]   ;;  %v615_v4 = vld [vmem:[#allocation8 + $0x8] sm:$0xff]   ;;  %v616_v5 = vld [vmem:[#allocation6 + $0x10] sm:$0xff]   ;;  %s799_s4 = smov [#allocation12]  }
  0x5d   :  { %556 = vmatprep.mubr.msk.bf16.mxu0 %vm798_vm0, %v797_v0  ;;  %576 = vmatprep.mubr.msk.bf16.mxu1 %vm798_vm0, %v797_v0  ;;  %v617_v6 = vld [vmem:[#allocation8 + $0x10] sm:$0xff]   ;;  %v618_v7 = vld [vmem:[#allocation6 + $0x18] sm:$0xff]   ;;  %v620_v9 = vld [vmem:[#allocation6 + $0x20] sm:$0xff]   ;;  %s472_s29 = sshll.u32 %s799_s4, 4  ;;  %s473_s29 = int_to_ptr.vmem [resolvable:$true] %s472_s29 }
  0x5e   :  { %541 = vmatpush3.bf16.msra.mxu0 %v612_v1  ;;  %561 = vmatpush3.bf16.msra.mxu1 %v613_v2  ;;  %v619_v8 = vld [vmem:[#allocation8 + $0x18] sm:$0xff]   ;;  %v621_v10 = vld [vmem:[#allocation8 + $0x20] sm:$0xff]   ;;  %v622_v11 = vld [vmem:[#allocation6 + $0x28] sm:$0xff]   ;;  %s758_s7 = scalar_lea.vmem %s473_s29, 256  ;;  %p763_p13 = scmp.lt.s32.totalorder %s473_s29, %s473_s29 }
  0x5f   :  { %542 = vmatprep.subr.bf16.mxu0 %v797_v0  ;;  %562 = vmatprep.subr.bf16.mxu1 %v797_v0  ;;  %v623_v12 = vld [vmem:[#allocation8 + $0x28] sm:$0xff]   ;;  %v624_v13 = vld [vmem:[#allocation6 + $0x30] sm:$0xff]   ;;  %v626_v15 = vld [vmem:[#allocation6 + $0x38] sm:$0xff]   ;;  %p759_p12 = scmp.ne.s32.totalorder %s473_s29, %s758_s7  ;;  %p764_p0 = scmp.lt.s32.totalorder %s758_s7, %s758_s7 }
  0x60   :  { %v625_v14 = vld [vmem:[#allocation8 + $0x30] sm:$0xff]   ;;  %v95_v17 = vld [vmem:[#allocation3 + $0x8] sm:$0xff]  ;;  %v628_v20 = vld [vmem:[#allocation9] sm:$0xff]  }
  0x61   :  { %v94_v16 = vld [vmem:[#allocation3] sm:$0xff]  ;;  %v627_v18 = vld [vmem:[#allocation8 + $0x38] sm:$0xff]   ;;  %v629_v21 = vld [vmem:[#allocation9 + $0x8] sm:$0xff]   ;;  %p765_p1 = por %p764_p0, %p763_p13 }
  0x62   :  { %543 = vmatpush3.bf16.msra.mxu0 %v614_v3  ;;  %563 = vmatpush3.bf16.msra.mxu1 %v615_v4  ;;  %v96_v19 = vpack.c.bf16 %v95_v17, %v94_v16  ;;  %v630_v22 = vld [vmem:[#allocation9 + $0x10] sm:$0xff]   ;;  %v631_v23 = vld [vmem:[#allocation9 + $0x18] sm:$0xff]   ;;  %v632_v24 = vld [vmem:[#allocation9 + $0x20] sm:$0xff]  }
  0x63   :  { %544 = vmatprep.subr.bf16.mxu0 %v797_v0  ;;  %564 = vmatprep.subr.bf16.mxu1 %v797_v0  ;;  %v633_v25 = vld [vmem:[#allocation9 + $0x28] sm:$0xff]   ;;  %v634_v26 = vld [vmem:[#allocation9 + $0x30] sm:$0xff]   ;;  %v635_v27 = vld [vmem:[#allocation9 + $0x38] sm:$0xff]   ;;  %p766_p2 = pnand %p765_p1, %p759_p12 }
  0x64   :  { %v512_v62 = vld [vmem:[#allocation11] ss:$0 sm:$0xff] }
  0x66   :  { %545 = vmatpush3.bf16.msra.mxu0 %v616_v5  ;;  %565 = vmatpush3.bf16.msra.mxu1 %v617_v6 }
  0x67   :  { %546 = vmatprep.subr.bf16.mxu0 %v797_v0  ;;  %566 = vmatprep.subr.bf16.mxu1 %v797_v0 }
  0x6a   :  { %547 = vmatpush3.bf16.msra.mxu0 %v618_v7  ;;  %567 = vmatpush3.bf16.msra.mxu1 %v619_v8 }
  0x6b   :  { %548 = vmatprep.subr.bf16.mxu0 %v797_v0  ;;  %568 = vmatprep.subr.bf16.mxu1 %v797_v0 }
  0x6e   :  { %549 = vmatpush3.bf16.msra.mxu0 %v620_v9  ;;  %569 = vmatpush3.bf16.msra.mxu1 %v621_v10 }
  0x6f   :  { %550 = vmatprep.subr.bf16.mxu0 %v797_v0  ;;  %570 = vmatprep.subr.bf16.mxu1 %v797_v0 }
  0x72   :  { %551 = vmatpush3.bf16.msra.mxu0 %v622_v11  ;;  %571 = vmatpush3.bf16.msra.mxu1 %v623_v12 }
  0x73   :  { %552 = vmatprep.subr.bf16.mxu0 %v797_v0  ;;  %572 = vmatprep.subr.bf16.mxu1 %v797_v0 }
  0x76   :  { %553 = vmatpush3.bf16.msra.mxu0 %v624_v13  ;;  %573 = vmatpush3.bf16.msra.mxu1 %v625_v14 }
  0x77   :  { %554 = vmatprep.subr.bf16.mxu0 %v797_v0  ;;  %574 = vmatprep.subr.bf16.mxu1 %v797_v0 }
  0x7a   :  { %555 = vmatpush3.bf16.msra.mxu0 %v626_v15  ;;  %575 = vmatpush3.bf16.msra.mxu1 %v627_v18 }
  0x7b   :  { %580 = vmatprep.subr.bf16.mxu0 %v797_v0 }
  0x7d   :  { %557 = vmatmul.mubr.bf16.vlgmr.msra.gmra.mrb[0].mxu0 %v96_v19  ;;  %577 = vmatmul.mubr.bf16.vlgmr.msra.gmra.mrb[0].mxu1 %v96_v19 }
  0x7e   :  { %596 = vmatprep.mubr.msk.bf16.mxu0 %vm798_vm0, %v797_v0  ;;  %581 = vmatpush3.bf16.msra.mxu0 %v628_v20 }
  0x7f   :  { %582 = vmatprep.subr.bf16.mxu0 %v797_v0 }
  0x82   :  { %583 = vmatpush3.bf16.msra.mxu0 %v629_v21 }
  0x83   :  { %584 = vmatprep.subr.bf16.mxu0 %v797_v0 }
  0x86   :  { %585 = vmatpush3.bf16.msra.mxu0 %v630_v22 }
  0x87   :  { %586 = vmatprep.subr.bf16.mxu0 %v797_v0 }
  0x8a   :  { %587 = vmatpush3.bf16.msra.mxu0 %v631_v23 }
  0x8b   :  { %588 = vmatprep.subr.bf16.mxu0 %v797_v0 }
  0x8e   :  { %589 = vmatpush3.bf16.msra.mxu0 %v632_v24 }
  0x8f   :  { %590 = vmatprep.subr.bf16.mxu0 %v797_v0 }
  0x92   :  { %591 = vmatpush3.bf16.msra.mxu0 %v633_v25 }
  0x93   :  { %592 = vmatprep.subr.bf16.mxu0 %v797_v0 }
  0x96   :  { %593 = vmatpush3.bf16.msra.mxu0 %v634_v26 }
  0x97   :  { %594 = vmatprep.subr.bf16.mxu0 %v797_v0 }
  0x9a   :  { %595 = vmatpush3.bf16.msra.mxu0 %v635_v27 }
 0x150   :  { %v195_v28 = vpop.f32.mrb[0].mxu0  ;;  %v300_v29 = vpop.f32.mrb[0].mxu1 }
 0x151   :  { %v558_v30 = vpop.f32.mrb[1].mxu0  ;;  %v307_v31 = vmul.f32 %v300_v29, %v195_v28  ;;  %v578_v32 = vpop.f32.mrb[1].mxu1 }
 0x152   :  { %v198_v33 = vpop.f32.mrb[2].mxu0  ;;  %v303_v34 = vpop.f32.mrb[2].mxu1 }
 0x153   :  { %v559_v35 = vpop.f32.mrb[3].mxu0  ;;  %v502_v36 = vmul.f32 -1.442695, %v307_v31  ;;  %v308_v37 = vmul.f32 %v303_v34, %v198_v33  ;;  %v579_v38 = vpop.f32.mrb[3].mxu1 }
 0x155   :  { %636 = vpow2.f32 %v502_v36  ;;  %v503_v39 = vmul.f32 -1.442695, %v308_v37 }
 0x157   :  { %638 = vpow2.f32 %v503_v39 }
 0x15f   :  { %v637_v40 = vpop.eup %636 }
 0x160   :  { %v315_v41 = vadd.f32 1.0, %v637_v40 }
 0x161   :  { %v639_v42 = vpop.eup %638 }
 0x162   :  { %640 = vrcp.f32 %v315_v41  ;;  %v316_v43 = vadd.f32 1.0, %v639_v42 }
 0x164   :  { %642 = vrcp.f32 %v316_v43 }
 0x16c   :  { %v641_v44 = vpop.eup %640 }
 0x16d   :  { %v321_v46 = vmul.f32 %v641_v44, %v307_v31 }
 0x16e   :  { %v643_v45 = vpop.eup %642 }
 0x16f   :  { %v322_v47 = vmul.f32 %v643_v45, %v308_v37 }
 0x171   :  { %v325_v48 = vpack.c.bf16 %v322_v47, %v321_v46 }
 0x173   :  { %597 = vmatmul.mubr.bf16.vlgmr.msra.gmra.mrb[4].mxu0 %v325_v48 }
 0x246   :  { %v424_v49 = vpop.f32.mrb[4].mxu0 }
 0x247   :  { %v598_v50 = vpop.f32.mrb[5].mxu0  ;;  %v440_v51 = vmul.f32 %v424_v49, %v424_v49 }
 0x248   :  { %v427_v52 = vpop.f32.mrb[6].mxu0 }
 0x249   :  { %442 = vadd.xlane.f32.xlu0 %v440_v51  ;;  %v599_v53 = vpop.f32.mrb[7].mxu0  ;;  %v441_v54 = vmul.f32 %v427_v52, %v427_v52 }
 0x24d   :  { %444 = vadd.xlane.f32.xlu0 %v441_v54 }
 0x2d6   :  { %v443_v55 = vpop.xlane.xlu0 %442 }
 0x2d7   :  { %v448_v56 = vmul.f32 0.0078125, %v443_v55 }
 0x2d9   :  { %v450_v57 = vadd.f32 1e-05, %v448_v56 }
 0x2da   :  { %v445_v58 = vpop.xlane.xlu0 %444 }
 0x2db   :  { %644 = vrsqrt.f32 %v450_v57  ;;  %v449_v59 = vmul.f32 0.0078125, %v445_v58 }
 0x2dd   :  { %v451_v60 = vadd.f32 1e-05, %v449_v59 }
 0x2df   :  { %646 = vrsqrt.f32 %v451_v60 }
 0x2e5   :  { %v645_v61 = vpop.eup %644 }
 0x2e6   :  { %v454_v63 = vmul.f32 %v645_v61, %v424_v49 }
 0x2e8   :  { %v463_v0 = vmul.f32 %v512_v62, %v454_v63 }
 0x2e9   :  { %v647_v1 = vpop.eup %646 }
 0x2ea   :  { %v455_v2 = vmul.f32 %v647_v1, %v427_v52  ;;  %465 = vst [vmem:[#allocation12] sm:$0xff] %v463_v0 }
 0x2ec   :  { %v464_v3 = vmul.f32 %v512_v62, %v455_v2 }
 0x2ee   :  { %466 = vst [vmem:[#allocation12 + $0x8] sm:$0xff] %v464_v3 }
 0x2ef   :  { %769 = shalt.err (!%p766_p2)
}
 0x2f0   :  { %s770_s11 = scalar_lea.hbm %s952_s5, 256 }
 0x2f1   :  { %p771_p3 = scmp.ne.s32.totalorder %s952_s5, %s770_s11  ;;  %p774_p4 = scmp.lt.u32.totalorder %s770_s11, %s952_s5 }
 0x2f3   :  { %p776_p5 = pnand %p774_p4, %p771_p3 }
 0x2f5   :  { %779 = shalt.err (!%p776_p5)
}
 0x2f6   :  { %478 = dma.vmem_to_hbm [thread:$0]  %s473_s29, 256, %s952_s5, [#allocation5], %s793_s3, %s793_s3, %s794_s30  }
 0x2f7   :  { %786 = dma.done.wait [#allocation5], 256  }
 0x2f8   :  { %787 = vsyncadd [#allocation5], 4294967040 }
 0x2f9   :  { %482 = vsyncpa [#allocation4], 1 }
 0x2fa   :  { %483 = vsyncpa [#allocation7], 1 }
 0x2fb   :  { %484 = vsyncpa [#allocation10], 1 }
 0x2fc   :  { %485 = vsyncpa [#allocation5], 1 }

</bundles_post_ra>
